<compile_context>
chip_gen: v7x
topology: tpu7x:2x2x1
jax: 0.10.0
libtpu: 0.0.40
codegen_flags: <defaults>
</compile_context>

<pallas_src>
import functools

import jax
import jax.numpy as jnp
from jax import lax
from jax.experimental import pallas as pl
from jax.experimental.pallas import tpu as pltpu


def _round_up(x, m):
    return ((x + m - 1) // m) * m


# --------------------------------------------------------------------------
# Pallas kernel: direct 4x4 convolution for one batch element.
# --------------------------------------------------------------------------
def _direct_conv_kernel(x_ref, w_ref, b_ref, o_ref, *, n_di, n_dj, act):
    """One grid step = one batch element, full direct convolution.

    x_ref : (1, Hv, Wv, Kc)      stride-1 'tap view' of the padded (and, for
                                 stride-2 layers, 2x2 space-to-depth'd) input,
                                 channels in lanes, bf16.
    w_ref : (n_di*n_dj, Kc, Cp)  per-tap weight matrices (scale pre-folded),
                                 bf16.
    b_ref : (1, Cp)              per-channel shift (conv bias / folded BN), f32.
    o_ref : (1, Ho, Wo, Cp)      lane-dense output (Cp = round_up(Cout, 128)).
    """
    ho_n = o_ref.shape[1]
    wo = o_ref.shape[2]
    bias = b_ref[...]                                   # (1, Cp), hoisted

    def row_body(ho, carry):
        acc = None
        for di in range(n_di):                          # static tap loops
            xrow = x_ref[0, ho + di, :, :]              # (Wv, Kc) bf16
            for dj in range(n_dj):
                t = di * n_dj + dj
                part = jnp.dot(xrow[dj:dj + wo, :], w_ref[t],
                               preferred_element_type=jnp.float32)
                acc = part if acc is None else acc + part
        y = acc + bias                                  # (Wo, Cp) f32
        if act == "leaky_relu":
            y = jnp.maximum(y, 0.2 * y)                 # single VPU op
        elif act == "sigmoid":
            # exp + approx reciprocal both run on the EUP slot
            y = pl.reciprocal(1.0 + jnp.exp(-y), approx=True)
        o_ref[0, ho, :, :] = y.astype(o_ref.dtype)
        return carry

    lax.fori_loop(0, ho_n, row_body, 0)


# --------------------------------------------------------------------------
# pallas_call wrapper (generation-aware VMEM limit, guarded Buffered(1)).
# --------------------------------------------------------------------------
@functools.lru_cache(maxsize=1)
def _compiler_params():
    """~3/4 of physical VMEM: ~48 MiB on a 64 MiB v7x TensorCore, ~96 MiB on
    128 MiB v5e/v6e parts."""
    try:
        cap = int(pltpu.get_tpu_info().vmem_capacity_bytes)
    except Exception:
        cap = 64 * 1024 * 1024
    limit = int(min((cap * 3) // 4, 96 * 1024 * 1024))
    return pltpu.CompilerParams(dimension_semantics=("parallel",),
                                vmem_limit_bytes=limit)


_SINGLE_BUFFER_WEIGHTS = None          # tri-state cache: None / True / False


def _run_conv(xv, wt, shift2, *, n_di, n_dj, act, Ho, Wo, Cp, out_dtype):
    global _SINGLE_BUFFER_WEIGHTS
    N, Hv, Wv, Kc = xv.shape
    T = wt.shape[0]

    def call(single_buffer):
        resident = {}
        if single_buffer and hasattr(pl, "Buffered"):
            # Weights / shift have a constant index_map (fetched once);
            # single-buffering them halves their resident VMEM.
            resident = dict(pipeline_mode=pl.Buffered(1))
        return pl.pallas_call(
            functools.partial(_direct_conv_kernel,
                              n_di=n_di, n_dj=n_dj, act=act),
            out_shape=jax.ShapeDtypeStruct((N, Ho, Wo, Cp), out_dtype),
            grid=(N,),
            in_specs=[
                pl.BlockSpec((1, Hv, Wv, Kc), lambda n: (n, 0, 0, 0)),
                pl.BlockSpec((T, Kc, Cp), lambda n: (0, 0, 0), **resident),
                pl.BlockSpec((1, Cp), lambda n: (0, 0), **resident),
            ],
            out_specs=pl.BlockSpec((1, Ho, Wo, Cp), lambda n: (n, 0, 0, 0)),
            compiler_params=_compiler_params(),
        )(xv, wt, shift2)

    if _SINGLE_BUFFER_WEIGHTS is None:
        try:
            out = call(True)
            _SINGLE_BUFFER_WEIGHTS = True
            return out
        except Exception:
            _SINGLE_BUFFER_WEIGHTS = False
    return call(_SINGLE_BUFFER_WEIGHTS)


# --------------------------------------------------------------------------
# One fused layer: 4x4 conv (direct) + per-channel affine + activation.
# --------------------------------------------------------------------------
def fused_conv2d(x_nhwc, w_oihw, scale, shift, *, stride, pad, act,
                 out_dtype=jnp.bfloat16):
    N, H, W, C = x_nhwc.shape
    Cout, Cin, kh, kw = w_oihw.shape
    assert (kh, kw) == (4, 4) and Cin == C and stride in (1, 2)
    Cp = _round_up(Cout, 128)

    x = x_nhwc.astype(jnp.bfloat16)
    xp = jnp.pad(x, ((0, 0), (pad, pad), (pad, pad), (0, 0)))
    Hp, Wp = H + 2 * pad, W + 2 * pad

    wt = jnp.transpose(w_oihw, (2, 3, 1, 0))            # (kh, kw, Cin, Cout)

    if stride == 2:
        # 2x2 space-to-depth: stride-2 4x4 conv == stride-1 2x2-tap conv over
        # "superpixels" with 4*C channels -> all taps are contiguous slices.
        Hp2, Wp2 = (Hp // 2) * 2, (Wp // 2) * 2         # drop an unused odd row
        Hq, Wq = Hp2 // 2, Wp2 // 2
        xv = (xp[:, :Hp2, :Wp2, :]
              .reshape(N, Hq, 2, Wq, 2, C)
              .transpose(0, 1, 3, 2, 4, 5)
              .reshape(N, Hq, Wq, 4 * C))
        wt = (wt.reshape(2, 2, 2, 2, C, Cout)           # (ti, ir, tj, jr, C, Co)
                .transpose(0, 2, 1, 3, 4, 5)            # (ti, tj, ir, jr, C, Co)
                .reshape(4, 4 * C, Cout))
        n_di = n_dj = 2
        Ho, Wo = Hq - 1, Wq - 1
    else:
        xv = xp
        wt = wt.reshape(16, C, Cout)                    # ((i, j), C, Cout)
        n_di = n_dj = 4
        Ho, Wo = Hp - 3, Wp - 3

    # Fold per-channel scale (conv bias => 1, eval-BN => gamma/sqrt(var+eps))
    # into the weights in f32, pad Cout lane-dense, cast to bf16 for the MXU.
    wt = wt.astype(jnp.float32) * scale.reshape(1, 1, Cout)
    if Cp != Cout:
        wt = jnp.pad(wt, ((0, 0), (0, 0), (0, Cp - Cout)))
        shift = jnp.pad(shift, (0, Cp - Cout))
    wt = wt.astype(jnp.bfloat16)
    shift2 = shift.reshape(1, Cp).astype(jnp.float32)

    out = _run_conv(xv, wt, shift2, n_di=n_di, n_dj=n_dj, act=act,
                    Ho=Ho, Wo=Wo, Cp=Cp, out_dtype=out_dtype)
    return out[..., :Cout]                              # (N, Ho, Wo, Cout)


# --------------------------------------------------------------------------
# Parameter construction mirroring Discriminator.__init__ (eval-mode BN).
# --------------------------------------------------------------------------
def init_discriminator_params(key, input_nc, ndf=64, n_layers=3):
    kw_ = 4
    eps = 1e-5
    keys = iter(jax.random.split(key, 2 * (n_layers + 2)))

    def conv_w(cout, cin):
        return 0.05 * jax.random.normal(next(keys), (cout, cin, kw_, kw_),
                                        jnp.float32)

    def bn_affine(c):
        gamma, beta = jnp.ones((c,), jnp.float32), jnp.zeros((c,), jnp.float32)
        mean, var = jnp.zeros((c,), jnp.float32), jnp.ones((c,), jnp.float32)
        s = gamma / jnp.sqrt(var + eps)
        return s, beta - mean * s

    layers = []
    # Conv(input_nc -> ndf, s=2) + bias, LeakyReLU
    w = conv_w(ndf, input_nc)
    b = 0.05 * jax.random.normal(next(keys), (ndf,), jnp.float32)
    layers.append(dict(w=w, scale=jnp.ones((ndf,), jnp.float32), shift=b,
                       stride=2, pad=1, act="leaky_relu"))

    nf_mult = 1
    for n in range(1, n_layers):
        nf_mult_prev, nf_mult = nf_mult, min(2 ** n, 8)
        cout, cin = ndf * nf_mult, ndf * nf_mult_prev
        s, sh = bn_affine(cout)
        layers.append(dict(w=conv_w(cout, cin), scale=s, shift=sh,
                           stride=2, pad=1, act="leaky_relu"))   # + Dropout (eval: id)

    nf_mult_prev, nf_mult = nf_mult, min(2 ** n_layers, 8)
    cout, cin = ndf * nf_mult, ndf * nf_mult_prev
    s, sh = bn_affine(cout)
    layers.append(dict(w=conv_w(cout, cin), scale=s, shift=sh,
                       stride=1, pad=1, act="leaky_relu"))       # + Dropout (eval: id)

    # Conv(ndf*nf_mult -> 1, s=1) + bias, Sigmoid
    w = conv_w(1, ndf * nf_mult)
    b = 0.05 * jax.random.normal(next(keys), (1,), jnp.float32)
    layers.append(dict(w=w, scale=jnp.ones((1,), jnp.float32), shift=b,
                       stride=1, pad=1, act="sigmoid"))
    return layers


def discriminator_forward(params, x_nchw):
    x = jnp.transpose(x_nchw, (0, 2, 3, 1))                  # NCHW -> NHWC
    last_idx = len(params) - 1
    for idx, layer in enumerate(params):
        x = fused_conv2d(
            x, layer["w"], layer["scale"], layer["shift"],
            stride=layer["stride"], pad=layer["pad"], act=layer["act"],
            out_dtype=jnp.float32 if idx == last_idx else jnp.bfloat16)
    return jnp.transpose(x, (0, 3, 1, 2))                    # NHWC -> NCHW


# --------------------------------------------------------------------------
# Pure-JAX f32 reference (eval-mode semantics) for the correctness check.
# --------------------------------------------------------------------------
def _reference_forward(params, x_nchw):
    x = jnp.transpose(x_nchw, (0, 2, 3, 1)).astype(jnp.float32)
    for layer in params:
        y = lax.conv_general_dilated(
            x, layer["w"], window_strides=(layer["stride"],) * 2,
            padding=[(layer["pad"],) * 2] * 2,
            dimension_numbers=("NHWC", "OIHW", "NHWC"),
            precision=lax.Precision.HIGHEST)
        y = y * layer["scale"] + layer["shift"]
        if layer["act"] == "leaky_relu":
            y = jnp.where(y >= 0, y, 0.2 * y)
        else:
            y = jax.nn.sigmoid(y)
        x = y
    return jnp.transpose(x, (0, 3, 1, 2))


# --------------------------------------------------------------------------
if __name__ == "__main__":
    key = jax.random.PRNGKey(0)
    k_param, k_x = jax.random.split(key)

    input_nc, ndf, n_layers = 4, 8, 3
    # Spatial 32 so the final two stride-1 k=4 convs still yield >=1 output pixel.
    x = jax.random.normal(k_x, (2, input_nc, 32, 32), jnp.float32)   # NCHW

    params = init_discriminator_params(k_param, input_nc, ndf=ndf,
                                       n_layers=n_layers)
    out = jax.block_until_ready(discriminator_forward(params, x))

    assert out.shape == (2, 1, 2, 2), out.shape
    # Sigmoid output range (small slack for the approx-reciprocal epilogue).
    assert bool(jnp.all((out >= -1e-3) & (out <= 1.0 + 1e-3)))

    # Loose-tolerance check vs. a pure-JAX f32 reference (bf16 MXU inputs /
    # activations + approx reciprocal => small numeric deviation is expected).
    ref = jax.block_until_ready(_reference_forward(params, x))
    err = float(jnp.max(jnp.abs(out - ref)))
    assert err < 5e-2, err
    print("KERNEL_OK")
</pallas_src>

<mosaic_0001>
module attributes {stable_mosaic.version = 11 : i64} {
  func.func @_direct_conv_kernel(%arg0: i32, %arg1: memref<1x17x17x16xbf16, #tpu.memory_space<vmem>>, %arg2: memref<4x16x128xbf16, #tpu.memory_space<vmem>>, %arg3: memref<1x128xf32, #tpu.memory_space<vmem>>, %arg4: memref<1x16x16x128xbf16, #tpu.memory_space<vmem>>) attributes {dimension_semantics = [#tpu.dimension_semantics<parallel>], iteration_bounds = array<i64: 2>, scalar_prefetch = 0 : i64, scratch_operands = 0 : i64, tpu.core_type = #tpu.core_type<tc>, window_params = [{transform_indices = @transform_0, window_bounds = array<i64: 1, 17, 17, 16>}, {pipeline_mode = #tpu.pipeline_mode<synchronous>, transform_indices = @transform_1, window_bounds = array<i64: 4, 16, 128>}, {pipeline_mode = #tpu.pipeline_mode<synchronous>, transform_indices = @transform_2, window_bounds = array<i64: 1, 128>}, {transform_indices = @transform_3, window_bounds = array<i64: 1, 16, 16, 128>}]} {
    %c0 = arith.constant 0 : index
    %c0_0 = arith.constant 0 : index
    %0 = vector.load %arg3[%c0, %c0_0] : memref<1x128xf32, #tpu.memory_space<vmem>>, vector<1x128xf32>
    %c0_i32 = arith.constant 0 : i32
    %c16_i32 = arith.constant 16 : i32
    %1 = arith.addi %c0_i32, %c16_i32 : i32
    %c1_i32 = arith.constant 1 : i32
    scf.for %arg5 = %c0_i32 to %1 step %c1_i32  : i32 {
      %c0_i32_2 = arith.constant 0 : i32
      %2 = arith.addi %arg5, %c0_i32_2 : i32
      %c0_3 = arith.constant 0 : index
      %3 = arith.index_cast %2 : i32 to index
      %c0_4 = arith.constant 0 : index
      %c0_5 = arith.constant 0 : index
      %4 = vector.load %arg1[%c0_3, %3, %c0_4, %c0_5] : memref<1x17x17x16xbf16, #tpu.memory_space<vmem>>, vector<1x1x17x16xbf16>
      %5 = vector.shape_cast %4 : vector<1x1x17x16xbf16> to vector<17x16xbf16>
      %6 = vector.extract_strided_slice %5 {offsets = [0, 0], sizes = [16, 16], strides = [1, 1]} : vector<17x16xbf16> to vector<16x16xbf16>
      %c0_6 = arith.constant 0 : index
      %c0_7 = arith.constant 0 : index
      %c0_8 = arith.constant 0 : index
      %7 = vector.load %arg2[%c0_6, %c0_7, %c0_8] : memref<4x16x128xbf16, #tpu.memory_space<vmem>>, vector<1x16x128xbf16>
      %8 = vector.shape_cast %7 : vector<1x16x128xbf16> to vector<16x128xbf16>
      %cst = arith.constant dense<0.000000e+00> : vector<16x128xf32>
      %9 = tpu.matmul %6, %8, %cst {dimension_numbers = #tpu.dot_dimension_numbers<[1], [0], [0], [1], [0, 0, 1, 1], [], []>} : vector<16x16xbf16>, vector<16x128xbf16>, vector<16x128xf32> -> vector<16x128xf32>
      %10 = vector.extract_strided_slice %5 {offsets = [1, 0], sizes = [16, 16], strides = [1, 1]} : vector<17x16xbf16> to vector<16x16xbf16>
      %c1 = arith.constant 1 : index
      %c0_9 = arith.constant 0 : index
      %c0_10 = arith.constant 0 : index
      %11 = vector.load %arg2[%c1, %c0_9, %c0_10] : memref<4x16x128xbf16, #tpu.memory_space<vmem>>, vector<1x16x128xbf16>
      %12 = vector.shape_cast %11 : vector<1x16x128xbf16> to vector<16x128xbf16>
      %cst_11 = arith.constant dense<0.000000e+00> : vector<16x128xf32>
      %13 = tpu.matmul %10, %12, %cst_11 {dimension_numbers = #tpu.dot_dimension_numbers<[1], [0], [0], [1], [0, 0, 1, 1], [], []>} : vector<16x16xbf16>, vector<16x128xbf16>, vector<16x128xf32> -> vector<16x128xf32>
      %14 = arith.addf %9, %13 : vector<16x128xf32>
      %c1_i32_12 = arith.constant 1 : i32
      %15 = arith.addi %arg5, %c1_i32_12 : i32
      %c0_13 = arith.constant 0 : index
      %16 = arith.index_cast %15 : i32 to index
      %c0_14 = arith.constant 0 : index
      %c0_15 = arith.constant 0 : index
      %17 = vector.load %arg1[%c0_13, %16, %c0_14, %c0_15] : memref<1x17x17x16xbf16, #tpu.memory_space<vmem>>, vector<1x1x17x16xbf16>
      %18 = vector.shape_cast %17 : vector<1x1x17x16xbf16> to vector<17x16xbf16>
      %19 = vector.extract_strided_slice %18 {offsets = [0, 0], sizes = [16, 16], strides = [1, 1]} : vector<17x16xbf16> to vector<16x16xbf16>
      %c2 = arith.constant 2 : index
      %c0_16 = arith.constant 0 : index
      %c0_17 = arith.constant 0 : index
      %20 = vector.load %arg2[%c2, %c0_16, %c0_17] : memref<4x16x128xbf16, #tpu.memory_space<vmem>>, vector<1x16x128xbf16>
      %21 = vector.shape_cast %20 : vector<1x16x128xbf16> to vector<16x128xbf16>
      %cst_18 = arith.constant dense<0.000000e+00> : vector<16x128xf32>
      %22 = tpu.matmul %19, %21, %cst_18 {dimension_numbers = #tpu.dot_dimension_numbers<[1], [0], [0], [1], [0, 0, 1, 1], [], []>} : vector<16x16xbf16>, vector<16x128xbf16>, vector<16x128xf32> -> vector<16x128xf32>
      %23 = arith.addf %14, %22 : vector<16x128xf32>
      %24 = vector.extract_strided_slice %18 {offsets = [1, 0], sizes = [16, 16], strides = [1, 1]} : vector<17x16xbf16> to vector<16x16xbf16>
      %c3 = arith.constant 3 : index
      %c0_19 = arith.constant 0 : index
      %c0_20 = arith.constant 0 : index
      %25 = vector.load %arg2[%c3, %c0_19, %c0_20] : memref<4x16x128xbf16, #tpu.memory_space<vmem>>, vector<1x16x128xbf16>
      %26 = vector.shape_cast %25 : vector<1x16x128xbf16> to vector<16x128xbf16>
      %cst_21 = arith.constant dense<0.000000e+00> : vector<16x128xf32>
      %27 = tpu.matmul %24, %26, %cst_21 {dimension_numbers = #tpu.dot_dimension_numbers<[1], [0], [0], [1], [0, 0, 1, 1], [], []>} : vector<16x16xbf16>, vector<16x128xbf16>, vector<16x128xf32> -> vector<16x128xf32>
      %28 = arith.addf %23, %27 : vector<16x128xf32>
      %29 = vector.broadcast %0 : vector<1x128xf32> to vector<16x128xf32>
      %30 = arith.addf %28, %29 : vector<16x128xf32>
      %cst_22 = arith.constant 2.000000e-01 : f32
      %31 = vector.broadcast %cst_22 : f32 to vector<16x128xf32>
      %32 = arith.mulf %31, %30 : vector<16x128xf32>
      %33 = arith.maximumf %30, %32 : vector<16x128xf32>
      %34 = arith.truncf %33 : vector<16x128xf32> to vector<16x128xbf16>
      %c0_23 = arith.constant 0 : index
      %35 = arith.index_cast %arg5 : i32 to index
      %c0_24 = arith.constant 0 : index
      %c0_25 = arith.constant 0 : index
      %36 = vector.load %arg4[%c0_23, %35, %c0_24, %c0_25] : memref<1x16x16x128xbf16, #tpu.memory_space<vmem>>, vector<1x1x16x128xbf16>
      %37 = vector.shape_cast %36 : vector<1x1x16x128xbf16> to vector<16x128xbf16>
      %38 = vector.shape_cast %34 : vector<16x128xbf16> to vector<1x1x16x128xbf16>
      tpu.vector_store %arg4[%c0_23, %35, %c0_24, %c0_25], %38 {strides = array<i32>} : memref<1x16x16x128xbf16, #tpu.memory_space<vmem>>, vector<1x1x16x128xbf16>,
    }
    %c16_i32_1 = arith.constant 16 : i32
    return
  }
  func.func @transform_0(%arg0: i32) -> (i32, i32, i32, i32) {
    %c0_i32 = arith.constant 0 : i32
    %c0_i32_0 = arith.constant 0 : i32
    %c0_i32_1 = arith.constant 0 : i32
    %c0_i32_2 = arith.constant 0 : i32
    return %arg0, %c0_i32, %c0_i32_0, %c0_i32_1 : i32, i32, i32, i32
  }
  func.func @transform_1(%arg0: i32) -> (i32, i32, i32) {
    %c0_i32 = arith.constant 0 : i32
    %c0_i32_0 = arith.constant 0 : i32
    %c0_i32_1 = arith.constant 0 : i32
    %c0_i32_2 = arith.constant 0 : i32
    return %c0_i32, %c0_i32_0, %c0_i32_1 : i32, i32, i32
  }
  func.func @transform_2(%arg0: i32) -> (i32, i32) {
    %c0_i32 = arith.constant 0 : i32
    %c0_i32_0 = arith.constant 0 : i32
    %c0_i32_1 = arith.constant 0 : i32
    return %c0_i32, %c0_i32_0 : i32, i32
  }
  func.func @transform_3(%arg0: i32) -> (i32, i32, i32, i32) {
    %c0_i32 = arith.constant 0 : i32
    %c0_i32_0 = arith.constant 0 : i32
    %c0_i32_1 = arith.constant 0 : i32
    %c0_i32_2 = arith.constant 0 : i32
    return %arg0, %c0_i32, %c0_i32_0, %c0_i32_1 : i32, i32, i32, i32
  }
}

module attributes {stable_mosaic.version = 11 : i64} {
  func.func @_direct_conv_kernel(%arg0: i32, %arg1: memref<1x17x17x16xbf16, #tpu.memory_space<vmem>>, %arg2: memref<4x16x128xbf16, #tpu.memory_space<vmem>>, %arg3: memref<1x128xf32, #tpu.memory_space<vmem>>, %arg4: memref<1x16x16x128xbf16, #tpu.memory_space<vmem>>) attributes {dimension_semantics = [#tpu.dimension_semantics<parallel>], iteration_bounds = array<i64: 2>, scalar_prefetch = 0 : i64, scratch_operands = 0 : i64, tpu.core_type = #tpu.core_type<tc>, window_params = [{transform_indices = @transform_0, window_bounds = array<i64: 1, 17, 17, 16>}, {pipeline_mode = #tpu.pipeline_mode<synchronous>, transform_indices = @transform_1, window_bounds = array<i64: 4, 16, 128>}, {pipeline_mode = #tpu.pipeline_mode<synchronous>, transform_indices = @transform_2, window_bounds = array<i64: 1, 128>}, {transform_indices = @transform_3, window_bounds = array<i64: 1, 16, 16, 128>}]} {
    %c0 = arith.constant 0 : index
    %c0_0 = arith.constant 0 : index
    %0 = vector.load %arg3[%c0, %c0_0] : memref<1x128xf32, #tpu.memory_space<vmem>>, vector<1x128xf32>
    %c0_i32 = arith.constant 0 : i32
    %c16_i32 = arith.constant 16 : i32
    %1 = arith.addi %c0_i32, %c16_i32 : i32
    %c1_i32 = arith.constant 1 : i32
    scf.for %arg5 = %c0_i32 to %1 step %c1_i32  : i32 {
      %c0_i32_2 = arith.constant 0 : i32
      %2 = arith.addi %arg5, %c0_i32_2 : i32
      %c0_3 = arith.constant 0 : index
      %3 = arith.index_cast %2 : i32 to index
      %c0_4 = arith.constant 0 : index
      %c0_5 = arith.constant 0 : index
      %4 = vector.load %arg1[%c0_3, %3, %c0_4, %c0_5] : memref<1x17x17x16xbf16, #tpu.memory_space<vmem>>, vector<1x1x17x16xbf16>
      %5 = vector.shape_cast %4 : vector<1x1x17x16xbf16> to vector<17x16xbf16>
      %6 = vector.extract_strided_slice %5 {offsets = [0, 0], sizes = [16, 16], strides = [1, 1]} : vector<17x16xbf16> to vector<16x16xbf16>
      %c0_6 = arith.constant 0 : index
      %c0_7 = arith.constant 0 : index
      %c0_8 = arith.constant 0 : index
      %7 = vector.load %arg2[%c0_6, %c0_7, %c0_8] : memref<4x16x128xbf16, #tpu.memory_space<vmem>>, vector<1x16x128xbf16>
      %8 = vector.shape_cast %7 : vector<1x16x128xbf16> to vector<16x128xbf16>
      %cst = arith.constant dense<0.000000e+00> : vector<16x128xf32>
      %9 = tpu.matmul %6, %8, %cst {dimension_numbers = #tpu.dot_dimension_numbers<[1], [0], [0], [1], [0, 0, 1, 1], [], []>} : vector<16x16xbf16>, vector<16x128xbf16>, vector<16x128xf32> -> vector<16x128xf32>
      %10 = vector.extract_strided_slice %5 {offsets = [1, 0], sizes = [16, 16], strides = [1, 1]} : vector<17x16xbf16> to vector<16x16xbf16>
      %c1 = arith.constant 1 : index
      %c0_9 = arith.constant 0 : index
      %c0_10 = arith.constant 0 : index
      %11 = vector.load %arg2[%c1, %c0_9, %c0_10] : memref<4x16x128xbf16, #tpu.memory_space<vmem>>, vector<1x16x128xbf16>
      %12 = vector.shape_cast %11 : vector<1x16x128xbf16> to vector<16x128xbf16>
      %cst_11 = arith.constant dense<0.000000e+00> : vector<16x128xf32>
      %13 = tpu.matmul %10, %12, %cst_11 {dimension_numbers = #tpu.dot_dimension_numbers<[1], [0], [0], [1], [0, 0, 1, 1], [], []>} : vector<16x16xbf16>, vector<16x128xbf16>, vector<16x128xf32> -> vector<16x128xf32>
      %14 = arith.addf %9, %13 : vector<16x128xf32>
      %c1_i32_12 = arith.constant 1 : i32
      %15 = arith.addi %arg5, %c1_i32_12 : i32
      %c0_13 = arith.constant 0 : index
      %16 = arith.index_cast %15 : i32 to index
      %c0_14 = arith.constant 0 : index
      %c0_15 = arith.constant 0 : index
      %17 = vector.load %arg1[%c0_13, %16, %c0_14, %c0_15] : memref<1x17x17x16xbf16, #tpu.memory_space<vmem>>, vector<1x1x17x16xbf16>
      %18 = vector.shape_cast %17 : vector<1x1x17x16xbf16> to vector<17x16xbf16>
      %19 = vector.extract_strided_slice %18 {offsets = [0, 0], sizes = [16, 16], strides = [1, 1]} : vector<17x16xbf16> to vector<16x16xbf16>
      %c2 = arith.constant 2 : index
      %c0_16 = arith.constant 0 : index
      %c0_17 = arith.constant 0 : index
      %20 = vector.load %arg2[%c2, %c0_16, %c0_17] : memref<4x16x128xbf16, #tpu.memory_space<vmem>>, vector<1x16x128xbf16>
      %21 = vector.shape_cast %20 : vector<1x16x128xbf16> to vector<16x128xbf16>
      %cst_18 = arith.constant dense<0.000000e+00> : vector<16x128xf32>
      %22 = tpu.matmul %19, %21, %cst_18 {dimension_numbers = #tpu.dot_dimension_numbers<[1], [0], [0], [1], [0, 0, 1, 1], [], []>} : vector<16x16xbf16>, vector<16x128xbf16>, vector<16x128xf32> -> vector<16x128xf32>
      %23 = arith.addf %14, %22 : vector<16x128xf32>
      %24 = vector.extract_strided_slice %18 {offsets = [1, 0], sizes = [16, 16], strides = [1, 1]} : vector<17x16xbf16> to vector<16x16xbf16>
      %c3 = arith.constant 3 : index
      %c0_19 = arith.constant 0 : index
      %c0_20 = arith.constant 0 : index
      %25 = vector.load %arg2[%c3, %c0_19, %c0_20] : memref<4x16x128xbf16, #tpu.memory_space<vmem>>, vector<1x16x128xbf16>
      %26 = vector.shape_cast %25 : vector<1x16x128xbf16> to vector<16x128xbf16>
      %cst_21 = arith.constant dense<0.000000e+00> : vector<16x128xf32>
      %27 = tpu.matmul %24, %26, %cst_21 {dimension_numbers = #tpu.dot_dimension_numbers<[1], [0], [0], [1], [0, 0, 1, 1], [], []>} : vector<16x16xbf16>, vector<16x128xbf16>, vector<16x128xf32> -> vector<16x128xf32>
      %28 = arith.addf %23, %27 : vector<16x128xf32>
      %29 = vector.broadcast %0 : vector<1x128xf32> to vector<16x128xf32>
      %30 = arith.addf %28, %29 : vector<16x128xf32>
      %cst_22 = arith.constant 2.000000e-01 : f32
      %31 = vector.broadcast %cst_22 : f32 to vector<16x128xf32>
      %32 = arith.mulf %31, %30 : vector<16x128xf32>
      %33 = arith.maximumf %30, %32 : vector<16x128xf32>
      %34 = arith.truncf %33 : vector<16x128xf32> to vector<16x128xbf16>
      %c0_23 = arith.constant 0 : index
      %35 = arith.index_cast %arg5 : i32 to index
      %c0_24 = arith.constant 0 : index
      %c0_25 = arith.constant 0 : index
      %36 = vector.load %arg4[%c0_23, %35, %c0_24, %c0_25] : memref<1x16x16x128xbf16, #tpu.memory_space<vmem>>, vector<1x1x16x128xbf16>
      %37 = vector.shape_cast %36 : vector<1x1x16x128xbf16> to vector<16x128xbf16>
      %38 = vector.shape_cast %34 : vector<16x128xbf16> to vector<1x1x16x128xbf16>
      tpu.vector_store %arg4[%c0_23, %35, %c0_24, %c0_25], %38 {strides = array<i32>} : memref<1x16x16x128xbf16, #tpu.memory_space<vmem>>, vector<1x1x16x128xbf16>,
    }
    %c16_i32_1 = arith.constant 16 : i32
    return
  }
  func.func @transform_0(%arg0: i32) -> (i32, i32, i32, i32) {
    %c0_i32 = arith.constant 0 : i32
    %c0_i32_0 = arith.constant 0 : i32
    %c0_i32_1 = arith.constant 0 : i32
    %c0_i32_2 = arith.constant 0 : i32
    return %arg0, %c0_i32, %c0_i32_0, %c0_i32_1 : i32, i32, i32, i32
  }
  func.func @transform_1(%arg0: i32) -> (i32, i32, i32) {
    %c0_i32 = arith.constant 0 : i32
    %c0_i32_0 = arith.constant 0 : i32
    %c0_i32_1 = arith.constant 0 : i32
    %c0_i32_2 = arith.constant 0 : i32
    return %c0_i32, %c0_i32_0, %c0_i32_1 : i32, i32, i32
  }
  func.func @transform_2(%arg0: i32) -> (i32, i32) {
    %c0_i32 = arith.constant 0 : i32
    %c0_i32_0 = arith.constant 0 : i32
    %c0_i32_1 = arith.constant 0 : i32
    return %c0_i32, %c0_i32_0 : i32, i32
  }
  func.func @transform_3(%arg0: i32) -> (i32, i32, i32, i32) {
    %c0_i32 = arith.constant 0 : i32
    %c0_i32_0 = arith.constant 0 : i32
    %c0_i32_1 = arith.constant 0 : i32
    %c0_i32_2 = arith.constant 0 : i32
    return %arg0, %c0_i32, %c0_i32_0, %c0_i32_1 : i32, i32, i32, i32
  }
}

</mosaic_0001>

<bundles_post_ra>
// kernel: tpu_custom_call.1
= control target key start
LH: loop header
LB: loop body
LE: loop exit
PB: predicated region body
PF: predicated region fallthrough
CT: control target
= control target key end

     0   :  { %8 = vsyncpa [#allocation3], 0  ;;  %s949_s0 = inlined_call_operand.vmem [shape: bf16[2,17,17,16], index: 0, kind: input, shape index: {}]   ;;  %s950_s1 = inlined_call_operand.vmem [shape: bf16[4,16,128], index: 1, kind: input, shape index: {}]   ;;  %s951_s2 = inlined_call_operand.vmem [shape: f32[1,128], index: 2, kind: input, shape index: {}]   ;;  %s952_s3 = inlined_call_operand.hbm [shape: bf16[2,16,16,128], index: 3, kind: output, shape index: {}]  }
   0x1   :  { %10 = vsyncpa [#allocation3 + $0x1], 0  ;;  %s795_s12 = smov 0   ;;  %s797_s13 = smov 0  }
   0x2   :  { %s799_s14 = smov 0   ;;  %s801_s15 = smov 0  }
   0x3 LB: > { %s816_s16 = sadd.s32 4294967295, %s764_s15   ;;  %s558_s17 = sadd.s32 4294967294, %s764_s15   ;;  %s764_s15 = sphi %s801_s15, %s958_s15   ;;  %s760_s14 = sphi %s799_s14, %s957_s14   ;;  %s756_s13 = sphi %s797_s13, %s956_s13   ;;  %s752_s12 = sphi %s795_s12, %s955_s12  }
   0x4   : > { %s820_s18 = sadd.s32 1, %s764_s15   ;;  %s91_s19 = sadd.s32 1, %s760_s14 }
   0x5   : > { %s88_s20 = ssub.s32 %s764_s15, %s820_s18  ;;  %p101_p0 = scmp.ne.s32.totalorder %s760_s14, %s756_s13 }
   0x6   : > { %p89_p1 = scmp.eq.s32.totalorder %s88_s20, 0  ;;  %p102_p2 = scmp.eq.s32.totalorder %s816_s16, 1 }
   0x7   : > { %p107_p3 = scmp.ne.s32.totalorder %s756_s13, %s752_s12  ;;  %p108_p4 = scmp.eq.s32.totalorder %s558_s17, 1 }
   0x8   : > { %s831_s21 = scalar_select %p89_p1, %s760_s14, %s91_s19  }
   0x9   : > { %p833_p5 = por %p102_p2, %p101_p0  ;;  %p837_p6 = por %p108_p4, %p107_p3 }
   0xa   : > { %p561_p7 = scmp.ge.s32.totalorder %s764_s15, 1  ;;  %p140_p8 = scmp.lt.s32.totalorder %s764_s15, 3 }
   0xc   : > { %p141_p9 = pnand %p561_p7, %p140_p8 }
   0xd   : > { %s161_s24 = sand.u32 (!%p141_p9), 1, %s756_s13   ;;  %p164_p10 = scmp.lt.s32.totalorder (!%p141_p9), %s816_s16, 1  ;;  %v848_v0 = vld [vmem:[%s951_s2] ss:$0 sm:$0xff] (!%p141_p9) }
   0xe   : > { %144 = sbr.rel (%p141_p9) target bundleno = 286 (0x11e), region = 32  ;;  %s852_s27 = sshll.u32 (!%p141_p9), %s161_s24, 7 }
   0xf   : > { %s163_s6 = scalar_lea.vmem (!%p141_p9), [#allocation2], %s852_s27  ;;  %s861_s7 = smov (!%p141_p9), 0  }
  0x15   : > { %s165_s28 = scalar_select %p164_p10, %s816_s16, 1 }
  0x17   : > { %s638_s29 = smul.u32 204, %s165_s28 }
  0x19   : > { %s858_s5 = scalar_lea.vmem %s949_s0, %s638_s29 }
  0x1a LB: >> { %v690_v1 = vld [vmem:[%s950_s1 + $0x8] sm:$0xff]   ;;  %v770_v2 = vmov 0.0   ;;  %v691_v3 = vld [vmem:[%s950_s1] sm:$0xff]   ;;  %vm771_vm0 = vmmov 0   ;;  %s596_s17 = smul.u32 12, %s768_s7  ;;  %vm215_vm1 = vcmask 130048   ;;  %s768_s7 = sphi %s861_s7, %s176_s7  }
  0x1b   : >> { %614 = vmatprep.subr.bf16.mxu0 %v770_v2  ;;  %620 = vmatprep.subr.bf16.mxu1 %v770_v2  ;;  %v695_v4 = vld [vmem:[%s950_s1 + $0x18] sm:$0xff]   ;;  %vm196_vm2 = vsmask.f32 7424  ;;  %v694_v18 = vld [vmem:[%s950_s1 + $0x10] sm:$0xff]   ;;  %s599_s29 = sshll.u32 %s768_s7, 3  ;;  %s176_s7 = sadd.s32 1, %s768_s7  }
  0x1c   : >> { %615 = vmatpush3.bf16.msra.mxu0 %v690_v1  ;;  %622 = vmatprep.mubr.msk.bf16.mxu1 %vm771_vm0, %v770_v2  ;;  %s179_s19 = scalar_lea.vmem %s858_s5, %s596_s17  ;;  %s467_s30 = scalar_lea.vmem %s163_s6, %s599_s29 [#allocation2] }
  0x1d   : >> { %621 = vmatpush3.bf16.msra.mxu1 %v691_v3  ;;  %616 = vmatprep.mubr.msk.bf16.mxu0 %vm771_vm0, %v770_v2  ;;  %v692_v5 = vld [vmem:[%s179_s19] sm:$0xff]   ;;  %v693_v6 = vld [vmem:[%s179_s19 + $0x8] ss:$0 sps:$4 sm:$0x11]   ;;  %v696_v7 = vld [vmem:[%s179_s19 + $0xc] sm:$0xff]   ;;  %p173_p11 = scmp.ge.s32.totalorder %s176_s7, 16  }
  0x1e   : >> { %626 = vmatprep.subr.bf16.mxu0 %v770_v2  ;;  %632 = vmatprep.subr.bf16.mxu1 %v770_v2  ;;  %v198_v8 = vshrl.u32 %v692_v5, 16  ;;  %v200_v9 = vshll.u32 %v692_v5, 16  ;;  %v205_v10 = vshll.u32 %v693_v6, 16  ;;  %v697_v11 = vld [vmem:[%s179_s19 + $0x14] ss:$0 sps:$4 sm:$0x11]  }
  0x1f   : >> { %v382_v13 = vshrl.u32 %v696_v7, 16  ;;  %v384_v14 = vshll.u32 %v696_v7, 16  ;;  %v389_v16 = vshll.u32 %v697_v11, 16  ;;  %s600_s4 = sshll.u32 (%p173_p11), %s816_s16, 11  ;;  %s484_s11 = sshll.u32 (%p173_p11), %s163_s6, 4  ;;  %s904_s11 = int_to_ptr.vmem [resolvable:$true] %s484_s11 }
  0x20   : >> { %623 = vmatmul.mubr.msk.bf16.vlgmr.msra.gmra.mrb[0].mxu1 %vm215_vm1, %v692_v5  ;;  %v202_v12 = vrot.slane %v200_v9, 1  ;;  %v207_v15 = vrot.slane %v205_v10, 1  ;;  %s900_s10 = scalar_lea.hbm (%p173_p11), %s952_s3, %s600_s4  ;;  %s908_s7 = scalar_lea.sflag (%p173_p11), [#allocation3], %s161_s24 }
  0x21   : >> { %633 = vmatpush3.bf16.msra.mxu1 %v695_v4  ;;  %634 = vmatprep.mubr.msk.bf16.mxu1 %vm771_vm0, %v770_v2  ;;  %v386_v19 = vrot.slane %v384_v14, 1  ;;  %v391_v20 = vrot.slane %v389_v16, 1  ;;  %s698_s5 = scalar_lea.vmem (%p173_p11), %s904_s11, 2048  ;;  %s772_s16 = smov (%p173_p11), [#allocation2]  }
  0x22   : >> { %v203_v17 = vor.u32 %v202_v12, %v198_v8  ;;  %p699_p12 = scmp.ne.s32.totalorder (%p173_p11), %s904_s11, %s698_s5  ;;  %s702_s17 = sshll.u32 (%p173_p11), %s772_s16, 4  ;;  %s703_s17 = int_to_ptr.vmem [resolvable:$false] %s702_s17 }
  0x23   : >> { %v387_v22 = vor.u32 %v386_v19, %v382_v13  ;;  %s704_s19 = scalar_lea.vmem (%p173_p11), %s703_s17, 4096  ;;  %p705_p1 = scmp.lt.s32.totalorder (%p173_p11), %s904_s11, %s703_s17 }
  0x24   : >> { %v208_v21 = vsel %vm196_vm2, %v203_v17, %v207_v15  ;;  %p700_p13 = pnand (%p173_p11), %p699_p12, %p833_p5  ;;  %p706_p2 = scmp.lt.s32.totalorder (%p173_p11), %s704_s19, %s698_s5 }
  0x25   : >> { %617 = vmatmul.mubr.msk.bf16.vlgmr.msra.gmra.mrb[0].mxu0 %vm215_vm1, %v208_v21  ;;  %v392_v23 = vsel %vm196_vm2, %v387_v22, %v391_v20 }
  0x26   : >> { %627 = vmatpush3.bf16.msra.mxu0 %v694_v18  ;;  %628 = vmatprep.mubr.msk.bf16.mxu0 %vm771_vm0, %v770_v2  ;;  %p701_p0 = pneg (%p173_p11), %p700_p13  ;;  %p707_p3 = por (%p173_p11), %p706_p2, %p705_p1 }
  0x28   : >> { %635 = vmatmul.mubr.msk.bf16.vlgmr.msra.gmra.mrb[4].mxu1 %vm215_vm1, %v392_v23  ;;  %p708_p4 = pnand (%p173_p11), %p707_p3, %p701_p0 }
  0x2d   : >> { %629 = vmatmul.mubr.msk.bf16.vlgmr.msra.gmra.mrb[4].mxu0 %vm215_vm1, %v696_v7 }
  0xf3   : >> { %v302_v24 = vpop.f32.mrb[0].mxu1 }
  0xf4   : >> { %v624_v25 = vpop.f32.mrb[1].mxu1 }
  0xf5   : >> { %v305_v26 = vpop.f32.mrb[2].mxu1 }
  0xf6   : >> { %v625_v27 = vpop.f32.mrb[3].mxu1 }
  0xf8   : >> { %v253_v28 = vpop.f32.mrb[0].mxu0 }
  0xf9   : >> { %v303_v29 = vadd.f32 %v302_v24, %v253_v28  ;;  %v618_v30 = vpop.f32.mrb[1].mxu0 }
  0xfa   : >> { %v256_v31 = vpop.f32.mrb[2].mxu0 }
  0xfb   : >> { %v436_v32 = vpop.f32.mrb[4].mxu1  ;;  %v306_v33 = vadd.f32 %v305_v26, %v256_v31  ;;  %v619_v34 = vpop.f32.mrb[3].mxu0 }
  0xfc   : >> { %v636_v35 = vpop.f32.mrb[5].mxu1 }
  0xfd   : >> { %v439_v36 = vpop.f32.mrb[6].mxu1 }
  0xfe   : >> { %v637_v37 = vpop.f32.mrb[7].mxu1 }
 0x100   : >> { %v367_v38 = vpop.f32.mrb[4].mxu0 }
 0x101   : >> { %v374_v39 = vadd.f32 %v367_v38, %v303_v29  ;;  %v630_v40 = vpop.f32.mrb[5].mxu0 }
 0x102   : >> { %v370_v41 = vpop.f32.mrb[6].mxu0 }
 0x103   : >> { %v443_v42 = vadd.f32 %v436_v32, %v374_v39  ;;  %v375_v43 = vadd.f32 %v370_v41, %v306_v33  ;;  %v631_v44 = vpop.f32.mrb[7].mxu0 }
 0x105   : >> { %v451_v45 = vadd.f32 %v848_v0, %v443_v42  ;;  %v444_v46 = vadd.f32 %v439_v36, %v375_v43 }
 0x107   : >> { %v453_v47 = vmul.f32 0.2, %v451_v45  ;;  %v452_v48 = vadd.f32 %v848_v0, %v444_v46 }
 0x109   : >> { %v454_v49 = vmul.f32 0.2, %v452_v48  ;;  %v455_v50 = vmax.f32 %v451_v45, %v453_v47  ;;  %175 = sbr.rel (!%p173_p11) target bundleno = 26 (0x1a), region = 80 }
 0x10b   : >> { %v456_v51 = vmax.f32 %v452_v48, %v454_v49 }
 0x10d   : >> { %v604_v52 = vpack.c.bf16 %v456_v51, %v455_v50 }
 0x10f   : >> { %605 = vst [vmem:[%s467_s30] sm:$0xff] %v604_v52  }
 0x110   : > { %711 = shalt.err (!%p708_p4)
}
 0x111   : > { %s712_s24 = scalar_lea.hbm %s900_s10, 2048  ;;  %s716_s20 = scalar_lea.hbm %s952_s3, 4096 }
 0x112   : > { %p713_p7 = scmp.ne.s32.totalorder %s900_s10, %s712_s24  ;;  %p717_p10 = scmp.lt.u32.totalorder %s900_s10, %s952_s3 }
 0x113   : > { %p718_p11 = scmp.lt.u32.totalorder %s716_s20, %s712_s24  ;;  %p720_p13 = scmp.lt.u32.totalorder %s712_s24, %s900_s10 }
 0x114   : > { %p714_p8 = pnand %p713_p7, %p833_p5 }
 0x115   : > { %p719_p12 = por %p718_p11, %p717_p10 }
 0x116   : > { %p715_p9 = pneg %p714_p8 }
 0x117   : > { %p721_p0 = por %p720_p13, %p719_p12 }
 0x119   : > { %p722_p1 = pnand %p721_p0, %p715_p9 }
 0x11b   : > { %725 = shalt.err (!%p722_p1)
}
 0x11c   : > { %s773_s28 = smov 64   ;;  %s774_s29 = smov 4  }
 0x11d   : > { %639 = dma.vmem_to_hbm [thread:$0]  (%p833_p5), %s904_s11, 2048, %s900_s10, %s908_s7, %s773_s28, %s773_s28, %s774_s29  }
 0x11e PF: > { %p645_p2 = scmp.ge.s32.totalorder %s764_s15, 2  ;;  %s499_s30 = sand.u32 1, %s752_s12  }
 0x11f   : > { %s500_s4 = scalar_lea.sflag [#allocation3], %s499_s30 }
 0x120   : > { %p642_p3 = pnand %p645_p2, %p837_p6 }
 0x122   : > { %747 = dma.done.wait (!%p642_p3), %s500_s4, 2048  }
 0x123   : > { %749 = vsyncadd (!%p642_p3), %s500_s4, 4294965248  ;;  %p13_p4 = scmp.ge.s32.totalorder %s820_s18, 4   ;;  %s955_s12 = smov %s756_s13 }
 0x124   : > { %s956_s13 = smov %s760_s14  ;;  %s957_s14 = smov %s831_s21 }
 0x125   : > { %s958_s15 = smov %s820_s18  ;;  %15 = sbr.rel (!%p13_p4) target bundleno = 3 (0x3), region = 91 }
 0x12c   :  { %505 = vsyncpa [#allocation3], 1 }
 0x12d   :  { %507 = vsyncpa [#allocation3 + $0x1], 1 }

// kernel: tpu_custom_call.1
= control target key start
LH: loop header
LB: loop body
LE: loop exit
PB: predicated region body
PF: predicated region fallthrough
CT: control target
= control target key end

     0   :  { %8 = vsyncpa [#allocation3], 0  ;;  %s949_s0 = inlined_call_operand.vmem [shape: bf16[2,17,17,16], index: 0, kind: input, shape index: {}]   ;;  %s950_s1 = inlined_call_operand.vmem [shape: bf16[4,16,128], index: 1, kind: input, shape index: {}]   ;;  %s951_s2 = inlined_call_operand.vmem [shape: f32[1,128], index: 2, kind: input, shape index: {}]   ;;  %s952_s3 = inlined_call_operand.hbm [shape: bf16[2,16,16,128], index: 3, kind: output, shape index: {}]  }
   0x1   :  { %10 = vsyncpa [#allocation3 + $0x1], 0  ;;  %s795_s12 = smov 0   ;;  %s797_s13 = smov 0  }
   0x2   :  { %s799_s14 = smov 0   ;;  %s801_s15 = smov 0  }
   0x3 LB: > { %s816_s16 = sadd.s32 4294967295, %s764_s15   ;;  %s558_s17 = sadd.s32 4294967294, %s764_s15   ;;  %s764_s15 = sphi %s801_s15, %s958_s15   ;;  %s760_s14 = sphi %s799_s14, %s957_s14   ;;  %s756_s13 = sphi %s797_s13, %s956_s13   ;;  %s752_s12 = sphi %s795_s12, %s955_s12  }
   0x4   : > { %s820_s18 = sadd.s32 1, %s764_s15   ;;  %s91_s19 = sadd.s32 1, %s760_s14 }
   0x5   : > { %s88_s20 = ssub.s32 %s764_s15, %s820_s18  ;;  %p101_p0 = scmp.ne.s32.totalorder %s760_s14, %s756_s13 }
   0x6   : > { %p89_p1 = scmp.eq.s32.totalorder %s88_s20, 0  ;;  %p102_p2 = scmp.eq.s32.totalorder %s816_s16, 1 }
   0x7   : > { %p107_p3 = scmp.ne.s32.totalorder %s756_s13, %s752_s12  ;;  %p108_p4 = scmp.eq.s32.totalorder %s558_s17, 1 }
   0x8   : > { %s831_s21 = scalar_select %p89_p1, %s760_s14, %s91_s19  }
   0x9   : > { %p833_p5 = por %p102_p2, %p101_p0  ;;  %p837_p6 = por %p108_p4, %p107_p3 }
   0xa   : > { %p561_p7 = scmp.ge.s32.totalorder %s764_s15, 1  ;;  %p140_p8 = scmp.lt.s32.totalorder %s764_s15, 3 }
   0xc   : > { %p141_p9 = pnand %p561_p7, %p140_p8 }
   0xd   : > { %s161_s24 = sand.u32 (!%p141_p9), 1, %s756_s13   ;;  %p164_p10 = scmp.lt.s32.totalorder (!%p141_p9), %s816_s16, 1  ;;  %v848_v0 = vld [vmem:[%s951_s2] ss:$0 sm:$0xff] (!%p141_p9) }
   0xe   : > { %144 = sbr.rel (%p141_p9) target bundleno = 286 (0x11e), region = 32  ;;  %s852_s27 = sshll.u32 (!%p141_p9), %s161_s24, 7 }
   0xf   : > { %s163_s6 = scalar_lea.vmem (!%p141_p9), [#allocation2], %s852_s27  ;;  %s861_s7 = smov (!%p141_p9), 0  }
  0x15   : > { %s165_s28 = scalar_select %p164_p10, %s816_s16, 1 }
  0x17   : > { %s638_s29 = smul.u32 204, %s165_s28 }
  0x19   : > { %s858_s5 = scalar_lea.vmem %s949_s0, %s638_s29 }
  0x1a LB: >> { %v690_v1 = vld [vmem:[%s950_s1 + $0x8] sm:$0xff]   ;;  %v770_v2 = vmov 0.0   ;;  %v691_v3 = vld [vmem:[%s950_s1] sm:$0xff]   ;;  %vm771_vm0 = vmmov 0   ;;  %s596_s17 = smul.u32 12, %s768_s7  ;;  %vm215_vm1 = vcmask 130048   ;;  %s768_s7 = sphi %s861_s7, %s176_s7  }
  0x1b   : >> { %614 = vmatprep.subr.bf16.mxu0 %v770_v2  ;;  %620 = vmatprep.subr.bf16.mxu1 %v770_v2  ;;  %v695_v4 = vld [vmem:[%s950_s1 + $0x18] sm:$0xff]   ;;  %vm196_vm2 = vsmask.f32 7424  ;;  %v694_v18 = vld [vmem:[%s950_s1 + $0x10] sm:$0xff]   ;;  %s599_s29 = sshll.u32 %s768_s7, 3  ;;  %s176_s7 = sadd.s32 1, %s768_s7  }
  0x1c   : >> { %615 = vmatpush3.bf16.msra.mxu0 %v690_v1  ;;  %622 = vmatprep.mubr.msk.bf16.mxu1 %vm771_vm0, %v770_v2  ;;  %s179_s19 = scalar_lea.vmem %s858_s5, %s596_s17  ;;  %s467_s30 = scalar_lea.vmem %s163_s6, %s599_s29 [#allocation2] }
  0x1d   : >> { %621 = vmatpush3.bf16.msra.mxu1 %v691_v3  ;;  %616 = vmatprep.mubr.msk.bf16.mxu0 %vm771_vm0, %v770_v2  ;;  %v692_v5 = vld [vmem:[%s179_s19] sm:$0xff]   ;;  %v693_v6 = vld [vmem:[%s179_s19 + $0x8] ss:$0 sps:$4 sm:$0x11]   ;;  %v696_v7 = vld [vmem:[%s179_s19 + $0xc] sm:$0xff]   ;;  %p173_p11 = scmp.ge.s32.totalorder %s176_s7, 16  }
  0x1e   : >> { %626 = vmatprep.subr.bf16.mxu0 %v770_v2  ;;  %632 = vmatprep.subr.bf16.mxu1 %v770_v2  ;;  %v198_v8 = vshrl.u32 %v692_v5, 16  ;;  %v200_v9 = vshll.u32 %v692_v5, 16  ;;  %v205_v10 = vshll.u32 %v693_v6, 16  ;;  %v697_v11 = vld [vmem:[%s179_s19 + $0x14] ss:$0 sps:$4 sm:$0x11]  }
  0x1f   : >> { %v382_v13 = vshrl.u32 %v696_v7, 16  ;;  %v384_v14 = vshll.u32 %v696_v7, 16  ;;  %v389_v16 = vshll.u32 %v697_v11, 16  ;;  %s600_s4 = sshll.u32 (%p173_p11), %s816_s16, 11  ;;  %s484_s11 = sshll.u32 (%p173_p11), %s163_s6, 4  ;;  %s904_s11 = int_to_ptr.vmem [resolvable:$true] %s484_s11 }
  0x20   : >> { %623 = vmatmul.mubr.msk.bf16.vlgmr.msra.gmra.mrb[0].mxu1 %vm215_vm1, %v692_v5  ;;  %v202_v12 = vrot.slane %v200_v9, 1  ;;  %v207_v15 = vrot.slane %v205_v10, 1  ;;  %s900_s10 = scalar_lea.hbm (%p173_p11), %s952_s3, %s600_s4  ;;  %s908_s7 = scalar_lea.sflag (%p173_p11), [#allocation3], %s161_s24 }
  0x21   : >> { %633 = vmatpush3.bf16.msra.mxu1 %v695_v4  ;;  %634 = vmatprep.mubr.msk.bf16.mxu1 %vm771_vm0, %v770_v2  ;;  %v386_v19 = vrot.slane %v384_v14, 1  ;;  %v391_v20 = vrot.slane %v389_v16, 1  ;;  %s698_s5 = scalar_lea.vmem (%p173_p11), %s904_s11, 2048  ;;  %s772_s16 = smov (%p173_p11), [#allocation2]  }
  0x22   : >> { %v203_v17 = vor.u32 %v202_v12, %v198_v8  ;;  %p699_p12 = scmp.ne.s32.totalorder (%p173_p11), %s904_s11, %s698_s5  ;;  %s702_s17 = sshll.u32 (%p173_p11), %s772_s16, 4  ;;  %s703_s17 = int_to_ptr.vmem [resolvable:$false] %s702_s17 }
  0x23   : >> { %v387_v22 = vor.u32 %v386_v19, %v382_v13  ;;  %s704_s19 = scalar_lea.vmem (%p173_p11), %s703_s17, 4096  ;;  %p705_p1 = scmp.lt.s32.totalorder (%p173_p11), %s904_s11, %s703_s17 }
  0x24   : >> { %v208_v21 = vsel %vm196_vm2, %v203_v17, %v207_v15  ;;  %p700_p13 = pnand (%p173_p11), %p699_p12, %p833_p5  ;;  %p706_p2 = scmp.lt.s32.totalorder (%p173_p11), %s704_s19, %s698_s5 }
  0x25   : >> { %617 = vmatmul.mubr.msk.bf16.vlgmr.msra.gmra.mrb[0].mxu0 %vm215_vm1, %v208_v21  ;;  %v392_v23 = vsel %vm196_vm2, %v387_v22, %v391_v20 }
  0x26   : >> { %627 = vmatpush3.bf16.msra.mxu0 %v694_v18  ;;  %628 = vmatprep.mubr.msk.bf16.mxu0 %vm771_vm0, %v770_v2  ;;  %p701_p0 = pneg (%p173_p11), %p700_p13  ;;  %p707_p3 = por (%p173_p11), %p706_p2, %p705_p1 }
  0x28   : >> { %635 = vmatmul.mubr.msk.bf16.vlgmr.msra.gmra.mrb[4].mxu1 %vm215_vm1, %v392_v23  ;;  %p708_p4 = pnand (%p173_p11), %p707_p3, %p701_p0 }
  0x2d   : >> { %629 = vmatmul.mubr.msk.bf16.vlgmr.msra.gmra.mrb[4].mxu0 %vm215_vm1, %v696_v7 }
  0xf3   : >> { %v302_v24 = vpop.f32.mrb[0].mxu1 }
  0xf4   : >> { %v624_v25 = vpop.f32.mrb[1].mxu1 }
  0xf5   : >> { %v305_v26 = vpop.f32.mrb[2].mxu1 }
  0xf6   : >> { %v625_v27 = vpop.f32.mrb[3].mxu1 }
  0xf8   : >> { %v253_v28 = vpop.f32.mrb[0].mxu0 }
  0xf9   : >> { %v303_v29 = vadd.f32 %v302_v24, %v253_v28  ;;  %v618_v30 = vpop.f32.mrb[1].mxu0 }
  0xfa   : >> { %v256_v31 = vpop.f32.mrb[2].mxu0 }
  0xfb   : >> { %v436_v32 = vpop.f32.mrb[4].mxu1  ;;  %v306_v33 = vadd.f32 %v305_v26, %v256_v31  ;;  %v619_v34 = vpop.f32.mrb[3].mxu0 }
  0xfc   : >> { %v636_v35 = vpop.f32.mrb[5].mxu1 }
  0xfd   : >> { %v439_v36 = vpop.f32.mrb[6].mxu1 }
  0xfe   : >> { %v637_v37 = vpop.f32.mrb[7].mxu1 }
 0x100   : >> { %v367_v38 = vpop.f32.mrb[4].mxu0 }
 0x101   : >> { %v374_v39 = vadd.f32 %v367_v38, %v303_v29  ;;  %v630_v40 = vpop.f32.mrb[5].mxu0 }
 0x102   : >> { %v370_v41 = vpop.f32.mrb[6].mxu0 }
 0x103   : >> { %v443_v42 = vadd.f32 %v436_v32, %v374_v39  ;;  %v375_v43 = vadd.f32 %v370_v41, %v306_v33  ;;  %v631_v44 = vpop.f32.mrb[7].mxu0 }
 0x105   : >> { %v451_v45 = vadd.f32 %v848_v0, %v443_v42  ;;  %v444_v46 = vadd.f32 %v439_v36, %v375_v43 }
 0x107   : >> { %v453_v47 = vmul.f32 0.2, %v451_v45  ;;  %v452_v48 = vadd.f32 %v848_v0, %v444_v46 }
 0x109   : >> { %v454_v49 = vmul.f32 0.2, %v452_v48  ;;  %v455_v50 = vmax.f32 %v451_v45, %v453_v47  ;;  %175 = sbr.rel (!%p173_p11) target bundleno = 26 (0x1a), region = 80 }
 0x10b   : >> { %v456_v51 = vmax.f32 %v452_v48, %v454_v49 }
 0x10d   : >> { %v604_v52 = vpack.c.bf16 %v456_v51, %v455_v50 }
 0x10f   : >> { %605 = vst [vmem:[%s467_s30] sm:$0xff] %v604_v52  }
 0x110   : > { %711 = shalt.err (!%p708_p4)
}
 0x111   : > { %s712_s24 = scalar_lea.hbm %s900_s10, 2048  ;;  %s716_s20 = scalar_lea.hbm %s952_s3, 4096 }
 0x112   : > { %p713_p7 = scmp.ne.s32.totalorder %s900_s10, %s712_s24  ;;  %p717_p10 = scmp.lt.u32.totalorder %s900_s10, %s952_s3 }
 0x113   : > { %p718_p11 = scmp.lt.u32.totalorder %s716_s20, %s712_s24  ;;  %p720_p13 = scmp.lt.u32.totalorder %s712_s24, %s900_s10 }
 0x114   : > { %p714_p8 = pnand %p713_p7, %p833_p5 }
 0x115   : > { %p719_p12 = por %p718_p11, %p717_p10 }
 0x116   : > { %p715_p9 = pneg %p714_p8 }
 0x117   : > { %p721_p0 = por %p720_p13, %p719_p12 }
 0x119   : > { %p722_p1 = pnand %p721_p0, %p715_p9 }
 0x11b   : > { %725 = shalt.err (!%p722_p1)
}
 0x11c   : > { %s773_s28 = smov 64   ;;  %s774_s29 = smov 4  }
 0x11d   : > { %639 = dma.vmem_to_hbm [thread:$0]  (%p833_p5), %s904_s11, 2048, %s900_s10, %s908_s7, %s773_s28, %s773_s28, %s774_s29  }
 0x11e PF: > { %p645_p2 = scmp.ge.s32.totalorder %s764_s15, 2  ;;  %s499_s30 = sand.u32 1, %s752_s12  }
 0x11f   : > { %s500_s4 = scalar_lea.sflag [#allocation3], %s499_s30 }
 0x120   : > { %p642_p3 = pnand %p645_p2, %p837_p6 }
 0x122   : > { %747 = dma.done.wait (!%p642_p3), %s500_s4, 2048  }
 0x123   : > { %749 = vsyncadd (!%p642_p3), %s500_s4, 4294965248  ;;  %p13_p4 = scmp.ge.s32.totalorder %s820_s18, 4   ;;  %s955_s12 = smov %s756_s13 }
 0x124   : > { %s956_s13 = smov %s760_s14  ;;  %s957_s14 = smov %s831_s21 }
 0x125   : > { %s958_s15 = smov %s820_s18  ;;  %15 = sbr.rel (!%p13_p4) target bundleno = 3 (0x3), region = 91 }
 0x12c   :  { %505 = vsyncpa [#allocation3], 1 }
 0x12d   :  { %507 = vsyncpa [#allocation3 + $0x1], 1 }

</bundles_post_ra>
